<compile_context>
chip_gen: v5e
topology: v5e:2x2
jax: 0.10.0
libtpu: 0.0.40
codegen_flags: <defaults>
</compile_context>

<pallas_src>
import math
import functools

import jax
import jax.numpy as jnp
from jax.experimental import pallas as pl
from jax.experimental.pallas import tpu as pltpu


# ----------------------------- in-kernel math -----------------------------

def _erf(x):
    # Abramowitz & Stegun 7.1.26 rational approximation (max abs err ~1.5e-7).
    a1, a2, a3, a4, a5 = 0.254829592, -0.284496736, 1.421413741, -1.453152027, 1.061405429
    p = 0.3275911
    sgn = jnp.where(x >= 0.0, 1.0, -1.0)
    ax = jnp.abs(x)
    t = pl.reciprocal(1.0 + p * ax, approx=True)      # EUP slot, off the VPU path
    poly = ((((a5 * t + a4) * t + a3) * t + a2) * t + a1) * t
    return sgn * (1.0 - poly * jnp.exp(-ax * ax))


def _gelu(x):
    # Exact (erf-based) GELU, matching PyTorch activation='gelu'.
    return 0.5 * x * (1.0 + _erf(x * (1.0 / math.sqrt(2.0))))


def _layer_norm(x, gamma, beta, eps=1e-5):
    mu = jnp.mean(x, axis=-1, keepdims=True)
    var = jnp.mean((x - mu) ** 2, axis=-1, keepdims=True)
    return (x - mu) * jax.lax.rsqrt(var + eps) * gamma + beta


# ------------------------------- kernels ----------------------------------

def embed_kernel(x_ref, w_ref, b_ref, pe_ref, o_ref, *, scale):
    # x_ref: [TM, Din]  w_ref: [Din, H] (bf16)  b_ref: [1, H]  pe_ref: [TM, H]
    h = jnp.dot(x_ref[...].astype(jnp.bfloat16), w_ref[...],
                preferred_element_type=jnp.float32)
    o_ref[...] = (h + b_ref[...]) * scale + pe_ref[...]


def layers_kernel(mask_ref, x_ref,
                  wqkv_ref, bqkv_ref, wo_ref, bo_ref,
                  w1_ref, b1_ref, w2_ref, b2_ref,
                  g1_ref, beta1_ref, g2_ref, beta2_ref,
                  o_ref, act_ref, attn_ref, *, n_heads, seq_len):
    """One grid step = one (row-tile, layer) pair of a post-LN encoder layer."""
    layer = pl.program_id(1)

    # Load the embedded activations into the resident VMEM scratch at layer 0.
    @pl.when(layer == 0)
    def _():
        act_ref[...] = x_ref[...]

    x = act_ref[...]                                    # [TM, H] f32
    TM, H = x.shape
    HD = H // n_heads
    n_seq = TM // seq_len
    scale = 1.0 / math.sqrt(HD)

    # ---- self-attention -----------------------------------------------------
    qkv = jnp.dot(x.astype(jnp.bfloat16), wqkv_ref[0],
                  preferred_element_type=jnp.float32) + bqkv_ref[0]    # [TM, 3H]
    # Split fused rows back into (sequence, position) — pure sublane split.
    qkv3 = qkv.reshape(n_seq, seq_len, 3 * H).astype(jnp.bfloat16)
    bias = mask_ref[...]                                # [S, S] causal -inf bias

    for hd_i in range(n_heads):                         # static unroll over heads
        q_h = qkv3[:, :, 0 * H + hd_i * HD: 0 * H + (hd_i + 1) * HD]
        k_h = qkv3[:, :, 1 * H + hd_i * HD: 1 * H + (hd_i + 1) * HD]
        v_h = qkv3[:, :, 2 * H + hd_i * HD: 2 * H + (hd_i + 1) * HD]
        # q·kᵀ via contraction on the last dims (no materialized transpose),
        # batched over every sequence in the row tile.
        s = jnp.einsum('gqd,gkd->gqk', q_h, k_h,
                       preferred_element_type=jnp.float32) * scale
        s = s + bias
        s = s - jnp.max(s, axis=-1, keepdims=True)
        p = jnp.exp(s)
        p = p * pl.reciprocal(jnp.sum(p, axis=-1, keepdims=True), approx=True)
        oh = jnp.einsum('gqk,gkd->gqd', p.astype(jnp.bfloat16), v_h,
                        preferred_element_type=jnp.float32)            # [g, S, HD]
        # Write this head's output straight into the VMEM slab (no concat).
        attn_ref[:, hd_i * HD:(hd_i + 1) * HD] = oh.reshape(TM, HD)

    attn = jnp.dot(attn_ref[...].astype(jnp.bfloat16), wo_ref[0],
                   preferred_element_type=jnp.float32) + bo_ref[0]

    y = _layer_norm(x + attn, g1_ref[0], beta1_ref[0])

    # ---- feed-forward (GELU) -------------------------------------------------
    ff = jnp.dot(y.astype(jnp.bfloat16), w1_ref[0],
                 preferred_element_type=jnp.float32) + b1_ref[0]
    ff = _gelu(ff)
    ff = jnp.dot(ff.astype(jnp.bfloat16), w2_ref[0],
                 preferred_element_type=jnp.float32) + b2_ref[0]

    act_ref[...] = _layer_norm(y + ff, g2_ref[0], beta2_ref[0])

    @pl.when(layer == pl.num_programs(1) - 1)
    def _():
        o_ref[...] = act_ref[...]


# ------------------------------ wrappers -----------------------------------

def _row_tile(batch, seq, target_rows=256):
    """Largest row tile made of whole sequences, dividing batch*seq, ~target."""
    spt = max(1, min(batch, max(1, target_rows // seq)))
    while batch % spt != 0:
        spt -= 1
    tm = spt * seq
    if tm % 8 != 0:          # (8,128) sublane rule, unless tile == full dim
        tm = batch * seq
    return tm


def embed_forward(x2d, w_in, b_in, pe_rows, scale, tm):
    BS, Din = x2d.shape
    H = w_in.shape[1]
    kernel = functools.partial(embed_kernel, scale=scale)
    return pl.pallas_call(
        kernel,
        out_shape=jax.ShapeDtypeStruct((BS, H), jnp.float32),
        grid_spec=pltpu.PrefetchScalarGridSpec(
            num_scalar_prefetch=0,
            grid=(BS // tm,),
            in_specs=[
                pl.BlockSpec((tm, Din), lambda r: (r, 0)),
                pl.BlockSpec((Din, H), lambda r: (0, 0)),
                pl.BlockSpec((1, H), lambda r: (0, 0)),
                pl.BlockSpec((tm, H), lambda r: (r, 0)),
            ],
            out_specs=pl.BlockSpec((tm, H), lambda r: (r, 0)),
        ),
        compiler_params=pltpu.CompilerParams(dimension_semantics=("parallel",)),
    )(x2d, w_in, b_in, pe_rows)


def encoder_forward(h, mask, lp, n_heads, seq_len, tm):
    BS, H = h.shape
    L = lp["wqkv"].shape[0]
    F = lp["w1"].shape[2]
    kernel = functools.partial(layers_kernel, n_heads=n_heads, seq_len=seq_len)

    def wspec(shape):
        # One layer's worth of a stacked [L, ...] parameter; the layer grid
        # axis selects the slice, BlockSpec double-buffering prefetches l+1.
        return pl.BlockSpec((1,) + shape, lambda r, l: (l, 0, 0))

    return pl.pallas_call(
        kernel,
        out_shape=jax.ShapeDtypeStruct((BS, H), jnp.float32),
        grid_spec=pltpu.PrefetchScalarGridSpec(
            num_scalar_prefetch=0,
            grid=(BS // tm, L),                 # rows parallel, layers sequential
            in_specs=[
                pl.BlockSpec((seq_len, seq_len), lambda r, l: (0, 0)),   # mask
                pl.BlockSpec((tm, H), lambda r, l: (r, 0)),              # x (used at l==0)
                wspec((H, 3 * H)), wspec((1, 3 * H)),
                wspec((H, H)), wspec((1, H)),
                wspec((H, F)), wspec((1, F)),
                wspec((F, H)), wspec((1, H)),
                wspec((1, H)), wspec((1, H)),
                wspec((1, H)), wspec((1, H)),
            ],
            out_specs=pl.BlockSpec((tm, H), lambda r, l: (r, 0)),
            scratch_shapes=[
                pltpu.VMEM((tm, H), jnp.float32),   # resident activation
                pltpu.VMEM((tm, H), jnp.float32),   # attention head slab
            ],
        ),
        compiler_params=pltpu.CompilerParams(
            dimension_semantics=("parallel", "arbitrary")),
    )(mask, h,
      lp["wqkv"], lp["bqkv"], lp["wo"], lp["bo"],
      lp["w1"], lp["b1"], lp["w2"], lp["b2"],
      lp["g1"], lp["beta1"], lp["g2"], lp["beta2"])


def transformer_core_lm_forward(x, params, n_heads):
    """Pallas equivalent of TransformerCoreLM.forward. Returns (out, None)."""
    B, S, Din = x.shape
    H = params["w_in"].shape[1]
    BS = B * S
    tm = _row_tile(B, S)

    x2d = x.reshape(BS, Din)
    pe_rows = jnp.tile(params["pe"][:S], (B, 1))                       # [BS, H]
    idx = jnp.arange(S)
    mask = jnp.where(idx[None, :] > idx[:, None], -1e30, 0.0).astype(jnp.float32)

    h = embed_forward(x2d, params["w_in"], params["b_in"], pe_rows,
                      math.sqrt(H), tm)
    out = encoder_forward(h, mask, params["layers"], n_heads, S, tm)
    return out.reshape(B, S, H), None


# ----------------------------- param setup ---------------------------------

def make_positional_encoding(max_len, d_model):
    position = jnp.arange(max_len, dtype=jnp.float32)[:, None]
    div_term = jnp.exp(jnp.arange(0, d_model, 2, dtype=jnp.float32)
                       * (-math.log(10000.0) / d_model))
    pe = jnp.zeros((max_len, d_model), dtype=jnp.float32)
    pe = pe.at[:, 0::2].set(jnp.sin(position * div_term))
    pe = pe.at[:, 1::2].set(jnp.cos(position * div_term))
    return pe


def init_params(key, input_dim, hidden_dim, n_layers, bptt):
    H, F = hidden_dim, 4 * hidden_dim
    k_in, k_layers = jax.random.split(key)

    def w(k, shape, fan_in):
        # Matmul weights stored in bf16 (f32 accumulation happens in-kernel).
        return (jax.random.normal(k, shape, jnp.float32)
                / math.sqrt(fan_in)).astype(jnp.bfloat16)

    lkeys = jax.random.split(k_layers, n_layers * 4).reshape(n_layers, 4, 2)
    wqkv, wo, w1, w2 = [], [], [], []
    for li in range(n_layers):
        wqkv.append(w(lkeys[li, 0], (H, 3 * H), H))
        wo.append(w(lkeys[li, 1], (H, H), H))
        w1.append(w(lkeys[li, 2], (H, F), H))
        w2.append(w(lkeys[li, 3], (F, H), F))

    zeros = lambda shape: jnp.zeros((n_layers,) + shape, jnp.float32)
    ones = lambda shape: jnp.ones((n_layers,) + shape, jnp.float32)
    return {
        # PyTorch Linear weight is [out, in]; stored transposed (x @ W layout).
        "w_in": w(k_in, (input_dim, H), input_dim),
        "b_in": jnp.zeros((1, H), jnp.float32),
        "pe": make_positional_encoding(bptt, H),
        "layers": {
            "wqkv": jnp.stack(wqkv), "bqkv": zeros((1, 3 * H)),
            "wo": jnp.stack(wo),     "bo": zeros((1, H)),
            "w1": jnp.stack(w1),     "b1": zeros((1, F)),
            "w2": jnp.stack(w2),     "b2": zeros((1, H)),
            "g1": ones((1, H)), "beta1": zeros((1, H)),
            "g2": ones((1, H)), "beta2": zeros((1, H)),
        },
    }


# --------------------------------- main -------------------------------------

if __name__ == "__main__":
    # Small shapes consistent with the module's forward:
    # x: [batch=2, seq=8, input_dim=16], hidden=32, heads=4, layers=2, bptt=16.
    B, S, DIN, H, NH, NLAYERS, BPTT = 2, 8, 16, 32, 4, 2, 16

    key = jax.random.PRNGKey(0)
    k_x, k_p = jax.random.split(key)
    x = jax.random.normal(k_x, (B, S, DIN), jnp.float32)
    params = init_params(k_p, DIN, H, NLAYERS, BPTT)

    out, hidden = transformer_core_lm_forward(x, params, NH)
    out = jax.block_until_ready(out)
    assert out.shape == (B, S, H) and hidden is None
    assert bool(jnp.all(jnp.isfinite(out)))
    print("KERNEL_OK")
</pallas_src>

<mosaic_0001>
module attributes {stable_mosaic.version = 11 : i64} {
  func.func @embed_kernel(%arg0: i32, %arg1: memref<16x16xf32, #tpu.memory_space<vmem>>, %arg2: memref<16x32xbf16, #tpu.memory_space<vmem>>, %arg3: memref<1x32xf32, #tpu.memory_space<vmem>>, %arg4: memref<16x32xf32, #tpu.memory_space<vmem>>, %arg5: memref<16x32xf32, #tpu.memory_space<vmem>>) attributes {dimension_semantics = [#tpu.dimension_semantics<parallel>], iteration_bounds = array<i64: 1>, scalar_prefetch = 0 : i64, scratch_operands = 0 : i64, tpu.core_type = #tpu.core_type<tc>, window_params = [{transform_indices = @transform_0, window_bounds = array<i64: 16, 16>}, {pipeline_mode = #tpu.pipeline_mode<synchronous>, transform_indices = @transform_1, window_bounds = array<i64: 16, 32>}, {pipeline_mode = #tpu.pipeline_mode<synchronous>, transform_indices = @transform_2, window_bounds = array<i64: 1, 32>}, {transform_indices = @transform_3, window_bounds = array<i64: 16, 32>}, {transform_indices = @transform_4, window_bounds = array<i64: 16, 32>}]} {
    %c0 = arith.constant 0 : index
    %c0_0 = arith.constant 0 : index
    %0 = vector.load %arg1[%c0, %c0_0] : memref<16x16xf32, #tpu.memory_space<vmem>>, vector<16x16xf32>
    %1 = arith.truncf %0 : vector<16x16xf32> to vector<16x16xbf16>
    %c0_1 = arith.constant 0 : index
    %c0_2 = arith.constant 0 : index
    %2 = vector.load %arg2[%c0_1, %c0_2] : memref<16x32xbf16, #tpu.memory_space<vmem>>, vector<16x32xbf16>
    %cst = arith.constant dense<0.000000e+00> : vector<16x32xf32>
    %3 = tpu.matmul %1, %2, %cst {dimension_numbers = #tpu.dot_dimension_numbers<[1], [0], [0], [1], [0, 0, 1, 1], [], []>} : vector<16x16xbf16>, vector<16x32xbf16>, vector<16x32xf32> -> vector<16x32xf32>
    %c0_3 = arith.constant 0 : index
    %c0_4 = arith.constant 0 : index
    %4 = vector.load %arg3[%c0_3, %c0_4] : memref<1x32xf32, #tpu.memory_space<vmem>>, vector<1x32xf32>
    %5 = vector.broadcast %4 : vector<1x32xf32> to vector<16x32xf32>
    %6 = arith.addf %3, %5 : vector<16x32xf32>
    %cst_5 = arith.constant 5.65685415 : f32
    %7 = vector.broadcast %cst_5 : f32 to vector<16x32xf32>
    %8 = arith.mulf %6, %7 : vector<16x32xf32>
    %c0_6 = arith.constant 0 : index
    %c0_7 = arith.constant 0 : index
    %9 = vector.load %arg4[%c0_6, %c0_7] : memref<16x32xf32, #tpu.memory_space<vmem>>, vector<16x32xf32>
    %10 = arith.addf %8, %9 : vector<16x32xf32>
    %c0_8 = arith.constant 0 : index
    %c0_9 = arith.constant 0 : index
    %11 = vector.load %arg5[%c0_8, %c0_9] : memref<16x32xf32, #tpu.memory_space<vmem>>, vector<16x32xf32>
    tpu.vector_store %arg5[%c0_8, %c0_9], %10 {strides = array<i32>} : memref<16x32xf32, #tpu.memory_space<vmem>>, vector<16x32xf32>,
    return
  }
  func.func @transform_0(%arg0: i32) -> (i32, i32) {
    %c0_i32 = arith.constant 0 : i32
    %c0_i32_0 = arith.constant 0 : i32
    return %arg0, %c0_i32 : i32, i32
  }
  func.func @transform_1(%arg0: i32) -> (i32, i32) {
    %c0_i32 = arith.constant 0 : i32
    %c0_i32_0 = arith.constant 0 : i32
    %c0_i32_1 = arith.constant 0 : i32
    return %c0_i32, %c0_i32_0 : i32, i32
  }
  func.func @transform_2(%arg0: i32) -> (i32, i32) {
    %c0_i32 = arith.constant 0 : i32
    %c0_i32_0 = arith.constant 0 : i32
    %c0_i32_1 = arith.constant 0 : i32
    return %c0_i32, %c0_i32_0 : i32, i32
  }
  func.func @transform_3(%arg0: i32) -> (i32, i32) {
    %c0_i32 = arith.constant 0 : i32
    %c0_i32_0 = arith.constant 0 : i32
    return %arg0, %c0_i32 : i32, i32
  }
  func.func @transform_4(%arg0: i32) -> (i32, i32) {
    %c0_i32 = arith.constant 0 : i32
    %c0_i32_0 = arith.constant 0 : i32
    return %arg0, %c0_i32 : i32, i32
  }
}

</mosaic_0001>

<bundles_post_ra>
// kernel: tpu_custom_call.1
= control target key start
LH: loop header
LB: loop body
LE: loop exit
PB: predicated region body
PF: predicated region fallthrough
CT: control target
= control target key end

     0   :  { %9 = vsyncpa [#allocation3], 0  ;;  %s302_s0 = inlined_call_operand.hbm [shape: f32[16,16], index: 0, kind: input, shape index: {}]   ;;  %s303_s1 = inlined_call_operand.hbm [shape: bf16[16,32], index: 1, kind: input, shape index: {}]   ;;  %s304_s2 = inlined_call_operand.vmem [shape: f32[1,32], index: 2, kind: input, shape index: {}]   ;;  %s305_s3 = inlined_call_operand.hbm [shape: f32[16,32], index: 3, kind: input, shape index: {}]   ;;  %s306_s4 = inlined_call_operand.hbm [shape: f32[16,32], index: 4, kind: output, shape index: {}]  }
   0x1   :  { %10 = vsyncpa [#allocation6], 0  ;;  %s29_s17 = sshll.u32 %s303_s1, 4  ;;  %s30_s17 = int_to_ptr.hbm [resolvable:$true] %s29_s17 }
   0x2   :  { %11 = vsyncpa [#allocation4], 0  ;;  %s245_s18 = smov [#allocation5]   ;;  %s16_s22 = sshll.u32 %s302_s0, 4  ;;  %s17_s22 = int_to_ptr.hbm [resolvable:$true] %s16_s22 }
   0x3   :  { %s31_s19 = sshll.u32 %s245_s18, 4  ;;  %s246_s23 = smov 64   ;;  %s32_s19 = int_to_ptr.vmem [resolvable:$true] %s31_s19 }
   0x4   :  { %s247_s24 = smov 4   ;;  %s248_s25 = smov [#allocation2]  }
   0x5   :  { %37 = dma.hbm_to_vmem [thread:$0]  %s30_s17, 128, %s32_s19, [#allocation6], %s246_s23, %s246_s23, %s247_s24  }
   0x6   :  { %s18_s26 = sshll.u32 %s248_s25, 4  ;;  %s249_s27 = smov 128   ;;  %s19_s26 = int_to_ptr.vmem [resolvable:$true] %s18_s26 }
   0x7   :  { %s250_s28 = smov 8   ;;  %s44_s30 = sshll.u32 %s305_s3, 4  ;;  %s45_s30 = int_to_ptr.hbm [resolvable:$true] %s44_s30 }
   0x8   :  { %24 = dma.hbm_to_vmem [thread:$0]  %s17_s22, 256, %s19_s26, [#allocation3], %s249_s27, %s249_s27, %s250_s28  }
   0x9   :  { %s251_s5 = smov [#allocation7]  }
   0xa   :  { %s46_s0 = sshll.u32 %s251_s5, 4  ;;  %s47_s0 = int_to_ptr.vmem [resolvable:$true] %s46_s0 }
   0xb   :  { %52 = dma.hbm_to_vmem [thread:$0]  %s45_s30, 256, %s47_s0, [#allocation6], %s249_s27, %s249_s27, %s250_s28  }
   0xc   :  { %239 = dma.done.wait [#allocation3], 256  }
   0xd   :  { %240 = vsyncadd [#allocation3], 4294967040 }
   0xe   :  { %241 = dma.done.wait [#allocation6], 384  }
   0xf   :  { %242 = vsyncadd [#allocation6], 4294966912  ;;  %v133_v0 = vld [vmem:[#allocation5] sm:$0xff]  ;;  %v66_v1 = vld [vmem:[#allocation2] sm:$0xff]  ;;  %vm81_vm0 = vcmask 130048   ;;  %vm105_vm1 = vcmask 261120  }
  0x10   :  { %v67_v2 = vld [vmem:[#allocation2 + $0x8] sm:$0xff]  ;;  %92 = vmatpush.bf16.msra.mxu0 %v133_v0  ;;  %v142_v4 = vld [vmem:[%s304_s2] ss:$0 sm:$0xff]  ;;  %v101_v7 = vld [vmem:[#allocation7] sm:$0xff]  ;;  %s252_s7 = smov [#allocation8]   ;;  %s114_s11 = sshll.u32 %s306_s4, 4  ;;  %s115_s11 = int_to_ptr.hbm [resolvable:$true] %s114_s11 }
  0x11   :  { %v68_v3 = vpack.c.bf16 %v67_v2, %v66_v1  ;;  %v102_v12 = vld [vmem:[#allocation7 + $0x8] sm:$0xff]  ;;  %s112_s8 = sshll.u32 %s252_s7, 4  ;;  %s113_s8 = int_to_ptr.vmem [resolvable:$true] %s112_s8 }
  0x13   :  { %132 = vmatmul.msk.bf16.vlgmr.msra.gmra.mxu0 %vm81_vm0, %v68_v3 }
  0x90   :  { %v94_v5 = vpop.f32.mrf.mxu0 }
  0x91   :  { %v95_v6 = vadd.f32 %v142_v4, %v94_v5 }
  0x93   :  { %v99_v8 = vmul.f32 5.656854, %v95_v6 }
  0x95   :  { %v103_v9 = vadd.f32 %v101_v7, %v99_v8 }
  0x97   :  { %106 = vst.msk [vmem:[#allocation8] sm:$0xff] %vm105_vm1, %v103_v9 }
  0x98   :  { %v96_v10 = vpop.f32.mrf.mxu0 }
  0x99   :  { %v97_v11 = vadd.f32 %v142_v4, %v96_v10 }
  0x9b   :  { %v100_v13 = vmul.f32 5.656854, %v97_v11 }
  0x9d   :  { %v104_v14 = vadd.f32 %v102_v12, %v100_v13 }
  0x9f   :  { %107 = vst.msk [vmem:[#allocation8 + $0x8] sm:$0xff] %vm105_vm1, %v104_v14 }
  0xa0   :  { %120 = dma.vmem_to_hbm [thread:$0]  %s113_s8, 256, %s115_s11, [#allocation4], %s249_s27, %s249_s27, %s250_s28  }
  0xa1   :  { %243 = dma.done.wait [#allocation4], 256  }
  0xa2   :  { %244 = vsyncadd [#allocation4], 4294967040 }
  0xa3   :  { %125 = vsyncpa [#allocation3], 1 }
  0xa4   :  { %126 = vsyncpa [#allocation6], 1 }
  0xa5   :  { %127 = vsyncpa [#allocation4], 1 }

</bundles_post_ra>
